<compile_context>
chip_gen: v6e
topology: v6e:2x2x1
jax: 0.10.0
libtpu: 0.0.40
codegen_flags: <defaults>
</compile_context>

<pallas_src>
import functools

import numpy as np
import jax
import jax.numpy as jnp
from jax.experimental import pallas as pl
from jax.experimental.pallas import tpu as pltpu

a0 = 0.529167
ev_kcalpmol = 23.061

N_ELEM = 19          # elements 0..18 (up to Ar)
N_LANES = 128        # lane padding (min lane tile)
N_ROWS = 16          # sublane padding (11 real tables + 5 zero pad rows)

_TABLE_NAMES = ["tore", "qn", "ussc", "uppc", "gssc", "gspc",
                "hspc", "gp2c", "gppc", "eheat", "mass"]
EHEAT_ROW = _TABLE_NAMES.index("eheat")
QN_ROW = _TABLE_NAMES.index("qn")

_RAW_TABLES = {
    "tore":  [0.0, 1.0, 0.0, 1.0, 2.0, 3.0, 4.0, 5.0, 6.0, 7.0, 0.0, 1.0, 2.0, 3.0, 4.0, 5.0, 6.0, 7.0, 0.0],
    "qn":    [0.0, 1.0, 0.0, 2.0, 2.0, 2.0, 2.0, 2.0, 2.0, 2.0, 0.0, 3.0, 3.0, 3.0, 3.0, 3.0, 3.0, 3.0, 0.0],
    "ussc":  [0.0, 1.0, 0.0, 1.0, 2.0, 2.0, 2.0, 2.0, 2.0, 2.0, 0.0, 1.0, 2.0, 2.0, 2.0, 2.0, 2.0, 2.0, 0.0],
    "uppc":  [0.0, 0.0, 0.0, 0.0, 0.0, 1.0, 2.0, 3.0, 4.0, 5.0, 6.0, 0.0, 0.0, 1.0, 2.0, 3.0, 4.0, 5.0, 6.0],
    "gssc":  [0.0, 0.0, 0.0, 0.0, 1.0, 1.0, 1.0, 1.0, 1.0, 1.0, 0.0, 0.0, 1.0, 1.0, 1.0, 1.0, 1.0, 1.0, 0.0],
    "gspc":  [0.0, 0.0, 0.0, 0.0, 0.0, 2.0, 4.0, 6.0, 8.0, 10.0, 0.0, 0.0, 0.0, 2.0, 4.0, 6.0, 8.0, 10.0, 0.0],
    "hspc":  [0.0, 0.0, 0.0, 0.0, 0.0, -1.0, -2.0, -3.0, -4.0, -5.0, 0.0, 0.0, 0.0, -1.0, -2.0, -3.0, -4.0, -5.0, 0.0],
    "gp2c":  [0.0, 0.0, 0.0, 0.0, 0.0, 0.0, 1.5, 4.5, 6.5, 10.0, 0.0, 0.0, 0.0, 0.0, 1.5, 4.5, 6.5, 10.0, 0.0],
    "gppc":  [0.0, 0.0, 0.0, 0.0, 0.0, 0.0, -0.5, -1.5, -0.5, 0.0, 0.0, 0.0, 0.0, 0.0, -0.5, -1.5, -0.5, 0.0, 0.0],
    "eheat": [0.0, 52.102, 0.0, 38.41, 76.96, 135.7, 170.89, 113.0, 59.559, 18.89, 0.0, 25.85, 35.0, 79.49, 108.39, 75.57, 66.4, 28.99, 0.0],
    "mass":  [0.0, 1.0079, 4.0026, 6.94, 9.01218, 10.81, 12.011, 14.0067, 15.9994, 18.9984, 20.179, 22.98977, 24.305, 26.98154, 28.0855, 30.97376, 32.06, 35.453, 39.948],
}


def _constants_kernel(tables_ref, out_ref):
    """Minimal body: pass-through both vregs, overwrite only the eheat row.

    True division is kept (not multiply-by-reciprocal) for bit-for-bit parity
    with the PyTorch reference `eheat / ev_kcalpmol`.
    """
    out_ref[...] = tables_ref[...]                                 # (16, 128) f32
    out_ref[pl.ds(EHEAT_ROW, 1), :] = (
        tables_ref[pl.ds(EHEAT_ROW, 1), :] / ev_kcalpmol)          # (1, 128) row


@functools.lru_cache(maxsize=1)
def _compiled_builder():
    """Compile once per process: pallas_call + on-device slicing in ONE jit."""
    scale = pl.pallas_call(
        _constants_kernel,
        out_shape=jax.ShapeDtypeStruct((N_ROWS, N_LANES), jnp.float32),
        in_specs=[pl.BlockSpec(memory_space=pltpu.MemorySpace.VMEM)],
        out_specs=pl.BlockSpec(memory_space=pltpu.MemorySpace.VMEM),
        input_output_aliases={0: 0},   # elementwise in-place on the 8 KiB slab
    )

    @jax.jit
    def build(slab):
        scaled = scale(slab)
        tables = {name: scaled[r, :N_ELEM] for r, name in enumerate(_TABLE_NAMES)}
        # TODO(synk): PyTorch reference stores qn_int as int64; JAX default
        # (x64 disabled) keeps int32, which is sufficient for element indices <= 18.
        tables["qn_int"] = tables["qn"].astype(jnp.int32)
        return tables

    return build


@functools.lru_cache(maxsize=1)
def _build_constant_tables():
    """Host slab build -> one H2D upload -> one compiled dispatch -> device views."""
    slab_np = np.zeros((N_ROWS, N_LANES), dtype=np.float32)
    for r, name in enumerate(_TABLE_NAMES):
        slab_np[r, :N_ELEM] = np.asarray(_RAW_TABLES[name], dtype=np.float32)
    return _compiled_builder()(jnp.asarray(slab_np))


class Constants:
    """JAX/Pallas port of the seqm Constants module."""

    def __init__(self, length_conversion_factor=1.0 / a0,
                 energy_conversion_factor=1.0, do_timing=True):
        self.length_conversion_factor = length_conversion_factor
        self.energy_conversion_factor = energy_conversion_factor
        self.label = ['0', 'H', 'He', 'Li', 'Be', ' B', ' C', ' N', ' O', ' F',
                      'Ne', 'Na', 'Mg', 'Al', 'Si', ' P', ' S', 'Cl', 'Ar']

        tables = _build_constant_tables()   # cached: built once per process
        self.tore = tables["tore"]
        self.qn = tables["qn"]
        self.qn_int = tables["qn_int"]
        self.ussc = tables["ussc"]
        self.uppc = tables["uppc"]
        self.gssc = tables["gssc"]
        self.gspc = tables["gspc"]
        self.hspc = tables["hspc"]
        self.gp2c = tables["gp2c"]
        self.gppc = tables["gppc"]
        self.eheat = tables["eheat"]   # already divided by ev_kcalpmol in-kernel
        self.mass = tables["mass"]

        self.do_timing = do_timing
        if self.do_timing:
            self.timing = {'Hcore + STO Integrals': [], 'SCF': [],
                           'Force': [], 'MD': [], 'D*': []}

    def forward(self):
        # Original PyTorch forward is a no-op (`pass`) -> returns None.
        pass

    __call__ = forward


if __name__ == "__main__":
    # The module takes no forward inputs; the PRNG key is only kept for the
    # required deterministic-construction pattern.
    _ = jax.random.PRNGKey(0)

    const = Constants()
    const2 = Constants()   # exercises the cached path (no re-trace / re-dispatch)

    # Block on all device-resident tables.
    for arr in (const.tore, const.qn, const.qn_int, const.ussc, const.uppc,
                const.gssc, const.gspc, const.hspc, const.gp2c, const.gppc,
                const.eheat, const.mass):
        jax.block_until_ready(arr)

    # Sanity checks against the reference definitions.
    assert const.tore.shape == (N_ELEM,) and const.qn_int.dtype == jnp.int32
    assert jnp.allclose(
        const.eheat,
        jnp.asarray(_RAW_TABLES["eheat"], jnp.float32) / ev_kcalpmol,
        rtol=1e-6, atol=1e-6)
    assert jnp.array_equal(
        const.qn_int,
        jnp.asarray(np.asarray(_RAW_TABLES["qn"], np.float32).astype(np.int32)))
    assert jnp.array_equal(const.mass,
                           jnp.asarray(_RAW_TABLES["mass"], jnp.float32))
    assert jnp.array_equal(const.tore,
                           jnp.asarray(_RAW_TABLES["tore"], jnp.float32))
    assert const2.eheat is const.eheat            # cached tables reused
    assert const.forward() is None                # forward semantics: no-op

    print("KERNEL_OK")
</pallas_src>

<mosaic_0001>
module attributes {stable_mosaic.version = 11 : i64} {
  func.func @_constants_kernel(%arg0: memref<16x128xf32, #tpu.memory_space<vmem>>, %arg1: memref<16x128xf32, #tpu.memory_space<vmem>>) attributes {dimension_semantics = [], scalar_prefetch = 0 : i64, scratch_operands = 0 : i64, tpu.core_type = #tpu.core_type<tc>} {
    %c0 = arith.constant 0 : index
    %c0_0 = arith.constant 0 : index
    %0 = vector.load %arg0[%c0, %c0_0] : memref<16x128xf32, #tpu.memory_space<vmem>>, vector<16x128xf32>
    %c0_1 = arith.constant 0 : index
    %c0_2 = arith.constant 0 : index
    %1 = vector.load %arg1[%c0_1, %c0_2] : memref<16x128xf32, #tpu.memory_space<vmem>>, vector<16x128xf32>
    tpu.vector_store %arg1[%c0_1, %c0_2], %0 {strides = array<i32>} : memref<16x128xf32, #tpu.memory_space<vmem>>, vector<16x128xf32>,
    %c9 = arith.constant 9 : index
    %c0_3 = arith.constant 0 : index
    %2 = vector.load %arg0[%c9, %c0_3] : memref<16x128xf32, #tpu.memory_space<vmem>>, vector<1x128xf32>
    %cst = arith.constant 2.306100e+01 : f32
    %3 = vector.broadcast %cst : f32 to vector<1x128xf32>
    %4 = arith.divf %2, %3 : vector<1x128xf32>
    %c9_4 = arith.constant 9 : index
    %c0_5 = arith.constant 0 : index
    %5 = vector.load %arg1[%c9_4, %c0_5] : memref<16x128xf32, #tpu.memory_space<vmem>>, vector<1x128xf32>
    tpu.vector_store %arg1[%c9_4, %c0_5], %4 {strides = array<i32>} : memref<16x128xf32, #tpu.memory_space<vmem>>, vector<1x128xf32>,
    return
  }
}

</mosaic_0001>

<bundles_post_ra>
// kernel: build.1
= control target key start
LH: loop header
LB: loop body
LE: loop exit
PB: predicated region body
PF: predicated region fallthrough
CT: control target
= control target key end

     0   :  { %s48_s0 = inlined_call_operand.vmem [shape: f32[16,128], index: 0, kind: input, shape index: {}, may-alias: {0,1}]   ;;  %s49_s1 = inlined_call_operand.vmem [shape: f32[16,128], index: 1, kind: output, shape index: {}, may-alias: {0,1}]  }
   0x1   :  { %v9_v0 = vld [vmem:[%s48_s0 + $0x8] sm:$0xff]  ;;  %v8_v1 = vld [vmem:[%s48_s0] sm:$0xff] }
   0x2   :  { %11 = vst [vmem:[%s49_s1 + $0x8] sm:$0xff] %v9_v0  ;;  %10 = vst [vmem:[%s49_s1] sm:$0xff] %v8_v1 }
   0x9   :  { %v12_v2 = vld [vmem:[%s48_s0 + $0x9] sm:$0x1] }
   0xa   :  { %v14_v3 = vmul.f32 0.04336325, %v12_v2 }
   0xc   :  { %15 = vst [vmem:[%s49_s1 + $0x9] sm:$0x1] %v14_v3 }

</bundles_post_ra>
